<compile_context>
chip_gen: v7x
topology: tpu7x:2x2x1
jax: 0.10.0
libtpu: 0.0.40
codegen_flags: <defaults>
</compile_context>

<pallas_src>
import functools

import jax
import jax.numpy as jnp
from jax import lax
from jax.experimental import pallas as pl
from jax.experimental.pallas import tpu as pltpu


def _round_up(v, m):
    return -(-v // m) * m


def _pad_rows(a, rows):
    r = a.shape[0]
    if r == rows:
        return a
    return jnp.concatenate(
        [a, jnp.zeros((rows - r, a.shape[1]), a.dtype)], axis=0)


# ----------------------------- fused Pallas kernel ---------------------------

def _fused_forward_kernel(x_ref, y_ref, w1_ref, b1_ref, w2_ref, b2_ref,
                          w3_ref, b3_ref, o_ref, *, bx, by, h, o_dim):
    """Fused net_CDAN forward.

    Inputs:  x (bx, in_dim), y (by, in_dim), layer weights/biases (all in VMEM).
    Output:  one lane-dense packed slab o_ref of shape (rows, cols >= 2h+o_dim+1):
               [:h,   0:h            ] = cov(hx)
               [:h,   h:2h           ] = cov(hy)
               [:bx,  2h:2h+o_dim    ] = layer2(hx)
               [:,    2h+o_dim:      ] = mmd scalar (broadcast)
             written with a single unmasked full-tile store.
    """
    # ---- layer1 (shared weights), run once on the in-register concat [x; y]
    xy = jnp.concatenate([x_ref[...], y_ref[...]], axis=0)            # (n, in_dim)
    a1 = jnp.maximum(
        jnp.dot(xy, w1_ref[...], preferred_element_type=jnp.float32) + b1_ref[...],
        0.0)
    feat = jnp.maximum(
        jnp.dot(a1, w2_ref[...], preferred_element_type=jnp.float32) + b2_ref[...],
        0.0)                                                          # (n, h)
    hx = feat[:bx, :]
    hy = feat[bx:bx + by, :]

    # ---- biased RBF-kernel MMD: one Gram, one exp, one weighted reduction
    n = bx + by
    dn_last = (((1,), (1,)), ((), ()))          # feat @ feat.T, no materialized .T
    gram = lax.dot_general(feat, feat, dn_last, preferred_element_type=jnp.float32)
    sq = jnp.sum(feat * feat, axis=1, keepdims=True)                  # (n, 1)
    dist = jnp.maximum(sq + sq.T - 2.0 * gram, 0.0)                   # clamp fp noise
    gamma = 1.0 / (2.0 * float(h))              # fixed bandwidth sigma^2 = feature dim
    kmat = jnp.exp(-gamma * dist)               # single EUP stream
    ridx = lax.broadcasted_iota(jnp.int32, (n, n), 0)
    cidx = lax.broadcasted_iota(jnp.int32, (n, n), 1)
    rx = ridx < bx
    cx = cidx < bx
    # Block-constant weights: +1/bx^2 (xx), +1/by^2 (yy), -1/(bx*by) on both cross
    # blocks (sums to the usual -2/(bx*by) on the symmetric kernel matrix).
    wmat = jnp.where(rx & cx, 1.0 / (bx * bx),
                     jnp.where((~rx) & (~cx), 1.0 / (by * by),
                               -1.0 / (bx * by)))
    mmd = jnp.sum(wmat * kmat)                  # single XLU reduction

    # ---- sample covariances of hx, hy (dim-0-contracting dot_general, no fc.T)
    mean_x = jnp.sum(hx, axis=0, keepdims=True) * (1.0 / bx)
    mean_y = jnp.sum(hy, axis=0, keepdims=True) * (1.0 / by)
    fcx = hx - mean_x
    fcy = hy - mean_y
    dn_first = (((0,), (0,)), ((), ()))
    if bx == by:
        # Fuse both covariances into one matmul on the lane-concatenated features.
        fc = jnp.concatenate([fcx, fcy], axis=1)                      # (bx, 2h)
        big = lax.dot_general(fc, fc, dn_first,
                              preferred_element_type=jnp.float32)     # (2h, 2h)
        cov_x = big[:h, :h] * (1.0 / max(bx - 1, 1))
        cov_y = big[h:2 * h, h:2 * h] * (1.0 / max(by - 1, 1))
    else:
        cov_x = lax.dot_general(fcx, fcx, dn_first,
                                preferred_element_type=jnp.float32) * (
            1.0 / max(bx - 1, 1))
        cov_y = lax.dot_general(fcy, fcy, dn_first,
                                preferred_element_type=jnp.float32) * (
            1.0 / max(by - 1, 1))

    # ---- layer2 head on hx
    out = jnp.dot(hx, w3_ref[...], preferred_element_type=jnp.float32) + b3_ref[...]

    # ---- assemble the whole slab in registers, one unmasked lane-dense store
    rows, cols = o_ref.shape
    rest_w = cols - (2 * h + o_dim)
    slab = jnp.concatenate(
        [_pad_rows(cov_x, rows),
         _pad_rows(cov_y, rows),
         _pad_rows(out, rows),
         jnp.full((rows, rest_w), mmd, dtype=jnp.float32)],
        axis=1)
    o_ref[...] = slab


# ----------------------------- wrappers --------------------------------------

def _vmem_spec():
    return pl.BlockSpec(memory_space=pltpu.MemorySpace.VMEM)


def copula_kl(cov_x, cov_y, eps=1e-5):
    """KL between the Gaussian copulas (correlation matrices) of X and Y (JAX glue)."""
    def corr(c):
        d = jnp.sqrt(jnp.diag(c) + eps)
        r = c / (d[:, None] * d[None, :])
        return r + eps * jnp.eye(c.shape[0], dtype=c.dtype)
    Rx, Ry = corr(cov_x), corr(cov_y)
    H = Rx.shape[0]
    _, logdet_x = jnp.linalg.slogdet(Rx)
    _, logdet_y = jnp.linalg.slogdet(Ry)
    tr_term = jnp.trace(jnp.linalg.solve(Ry, Rx))   # tiny HxH solve: JAX glue
    return 0.5 * (tr_term - H + logdet_y - logdet_x)


def net_cdan_forward(params, x, y):
    bx, by = x.shape[0], y.shape[0]
    h = params["w1"].shape[1]
    o_dim = params["w3"].shape[1]

    rows = _round_up(max(h, bx), 8)
    cols = _round_up(2 * h + o_dim + 1, 128)   # keep the +1 lane for the mmd scalar

    kernel = functools.partial(_fused_forward_kernel,
                               bx=bx, by=by, h=h, o_dim=o_dim)
    slab = pl.pallas_call(
        kernel,
        out_shape=jax.ShapeDtypeStruct((rows, cols), jnp.float32),
        in_specs=[_vmem_spec()] * 8,
        out_specs=_vmem_spec(),
    )(x, y, params["w1"], params["b1"], params["w2"], params["b2"],
      params["w3"], params["b3"])

    cov_x = slab[:h, :h]
    cov_y = slab[:h, h:2 * h]
    out = slab[:bx, 2 * h:2 * h + o_dim]
    marginal_div = slab[0, 2 * h + o_dim]
    copula_distance = copula_kl(cov_x, cov_y)
    return marginal_div, copula_distance, out


# ----------------------------- parameter init ---------------------------------

def _linear_init(key, fan_in, fan_out):
    """Mimics torch.nn.Linear default init: U(-1/sqrt(fan_in), 1/sqrt(fan_in))."""
    kw, kb = jax.random.split(key)
    bound = 1.0 / jnp.sqrt(float(fan_in))
    w = jax.random.uniform(kw, (fan_in, fan_out), jnp.float32, -bound, bound)
    b = jax.random.uniform(kb, (1, fan_out), jnp.float32, -bound, bound)
    return w, b


def init_params(key, input_dim, hidden_dim, output_dim):
    k1, k2, k3 = jax.random.split(key, 3)
    w1, b1 = _linear_init(k1, input_dim, hidden_dim)
    w2, b2 = _linear_init(k2, hidden_dim, hidden_dim)
    w3, b3 = _linear_init(k3, hidden_dim, output_dim)
    return {"w1": w1, "b1": b1, "w2": w2, "b2": b2, "w3": w3, "b3": b3}


# ----------------------------- main --------------------------------------------

if __name__ == "__main__":
    input_dim, hidden_dim, output_dim = 11, 32, 1   # wine-quality-like dims
    Bx, By = 8, 8

    key = jax.random.PRNGKey(0)
    kp, kx, ky = jax.random.split(key, 3)
    params = init_params(kp, input_dim, hidden_dim, output_dim)
    x = jax.random.normal(kx, (Bx, input_dim), jnp.float32)
    y = jax.random.normal(ky, (By, input_dim), jnp.float32)

    marginal_div, copula_distance, out = net_cdan_forward(params, x, y)
    jax.block_until_ready((marginal_div, copula_distance, out))

    assert out.shape == (Bx, output_dim)
    assert marginal_div.shape == () and copula_distance.shape == ()
    print("KERNEL_OK")
</pallas_src>

<mosaic_0001>
module attributes {stable_mosaic.version = 11 : i64} {
  func.func @_fused_forward_kernel(%arg0: memref<8x11xf32, #tpu.memory_space<vmem>>, %arg1: memref<8x11xf32, #tpu.memory_space<vmem>>, %arg2: memref<11x32xf32, #tpu.memory_space<vmem>>, %arg3: memref<1x32xf32, #tpu.memory_space<vmem>>, %arg4: memref<32x32xf32, #tpu.memory_space<vmem>>, %arg5: memref<1x32xf32, #tpu.memory_space<vmem>>, %arg6: memref<32x1xf32, #tpu.memory_space<vmem>>, %arg7: memref<1x1xf32, #tpu.memory_space<vmem>>, %arg8: memref<32x128xf32, #tpu.memory_space<vmem>>) attributes {dimension_semantics = [], scalar_prefetch = 0 : i64, scratch_operands = 0 : i64, tpu.core_type = #tpu.core_type<tc>} {
    %c0 = arith.constant 0 : index
    %c0_0 = arith.constant 0 : index
    %0 = vector.load %arg0[%c0, %c0_0] : memref<8x11xf32, #tpu.memory_space<vmem>>, vector<8x11xf32>
    %c0_1 = arith.constant 0 : index
    %c0_2 = arith.constant 0 : index
    %1 = vector.load %arg1[%c0_1, %c0_2] : memref<8x11xf32, #tpu.memory_space<vmem>>, vector<8x11xf32>
    %2 = tpu.concatenate %0, %1 in 0 : vector<8x11xf32>, vector<8x11xf32> -> vector<16x11xf32>
    %c0_3 = arith.constant 0 : index
    %c0_4 = arith.constant 0 : index
    %3 = vector.load %arg2[%c0_3, %c0_4] : memref<11x32xf32, #tpu.memory_space<vmem>>, vector<11x32xf32>
    %cst = arith.constant dense<0.000000e+00> : vector<16x32xf32>
    %4 = tpu.matmul %2, %3, %cst {dimension_numbers = #tpu.dot_dimension_numbers<[1], [0], [0], [1], [0, 0, 1, 1], [], []>} : vector<16x11xf32>, vector<11x32xf32>, vector<16x32xf32> -> vector<16x32xf32>
    %c0_5 = arith.constant 0 : index
    %c0_6 = arith.constant 0 : index
    %5 = vector.load %arg3[%c0_5, %c0_6] : memref<1x32xf32, #tpu.memory_space<vmem>>, vector<1x32xf32>
    %6 = vector.broadcast %5 : vector<1x32xf32> to vector<16x32xf32>
    %7 = arith.addf %4, %6 : vector<16x32xf32>
    %cst_7 = arith.constant 0.000000e+00 : f32
    %8 = vector.broadcast %cst_7 : f32 to vector<16x32xf32>
    %9 = arith.maximumf %7, %8 : vector<16x32xf32>
    %c0_8 = arith.constant 0 : index
    %c0_9 = arith.constant 0 : index
    %10 = vector.load %arg4[%c0_8, %c0_9] : memref<32x32xf32, #tpu.memory_space<vmem>>, vector<32x32xf32>
    %cst_10 = arith.constant dense<0.000000e+00> : vector<16x32xf32>
    %11 = tpu.matmul %9, %10, %cst_10 {dimension_numbers = #tpu.dot_dimension_numbers<[1], [0], [0], [1], [0, 0, 1, 1], [], []>} : vector<16x32xf32>, vector<32x32xf32>, vector<16x32xf32> -> vector<16x32xf32>
    %c0_11 = arith.constant 0 : index
    %c0_12 = arith.constant 0 : index
    %12 = vector.load %arg5[%c0_11, %c0_12] : memref<1x32xf32, #tpu.memory_space<vmem>>, vector<1x32xf32>
    %13 = vector.broadcast %12 : vector<1x32xf32> to vector<16x32xf32>
    %14 = arith.addf %11, %13 : vector<16x32xf32>
    %cst_13 = arith.constant 0.000000e+00 : f32
    %15 = vector.broadcast %cst_13 : f32 to vector<16x32xf32>
    %16 = arith.maximumf %14, %15 : vector<16x32xf32>
    %17 = vector.extract_strided_slice %16 {offsets = [0, 0], sizes = [8, 32], strides = [1, 1]} : vector<16x32xf32> to vector<8x32xf32>
    %18 = vector.extract_strided_slice %16 {offsets = [8, 0], sizes = [8, 32], strides = [1, 1]} : vector<16x32xf32> to vector<8x32xf32>
    %cst_14 = arith.constant dense<0.000000e+00> : vector<16x16xf32>
    %19 = tpu.matmul %16, %16, %cst_14 {dimension_numbers = #tpu.dot_dimension_numbers<[1], [1], [0], [0], [0, 0, 1, 0], [], []>} : vector<16x32xf32>, vector<16x32xf32>, vector<16x16xf32> -> vector<16x16xf32>
    %20 = arith.mulf %16, %16 : vector<16x32xf32>
    %cst_15 = arith.constant dense<0.000000e+00> : vector<16xf32>
    %21 = vector.multi_reduction <add>, %20, %cst_15 [1] : vector<16x32xf32> to vector<16xf32>
    %22 = vector.shape_cast %21 : vector<16xf32> to vector<16x1xf32>
    %23 = tpu.transpose %22, [1, 0] : vector<16x1xf32> -> vector<1x16xf32>
    %24 = vector.broadcast %22 : vector<16x1xf32> to vector<16x16xf32>
    %25 = vector.broadcast %23 : vector<1x16xf32> to vector<16x16xf32>
    %26 = arith.addf %24, %25 : vector<16x16xf32>
    %cst_16 = arith.constant 2.000000e+00 : f32
    %27 = vector.broadcast %cst_16 : f32 to vector<16x16xf32>
    %28 = arith.mulf %27, %19 : vector<16x16xf32>
    %29 = arith.subf %26, %28 : vector<16x16xf32>
    %cst_17 = arith.constant 0.000000e+00 : f32
    %30 = vector.broadcast %cst_17 : f32 to vector<16x16xf32>
    %31 = arith.maximumf %29, %30 : vector<16x16xf32>
    %cst_18 = arith.constant -1.562500e-02 : f32
    %32 = vector.broadcast %cst_18 : f32 to vector<16x16xf32>
    %33 = arith.mulf %32, %31 : vector<16x16xf32>
    %34 = math.exp %33 : vector<16x16xf32>
    %35 = tpu.iota {dimensions = array<i32: 0>} : vector<16x16xi32>
    %36 = tpu.iota {dimensions = array<i32: 1>} : vector<16x16xi32>
    %c8_i32 = arith.constant 8 : i32
    %37 = vector.broadcast %c8_i32 : i32 to vector<16x16xi32>
    %38 = arith.cmpi slt, %35, %37 : vector<16x16xi32>
    %c8_i32_19 = arith.constant 8 : i32
    %39 = vector.broadcast %c8_i32_19 : i32 to vector<16x16xi32>
    %40 = arith.cmpi slt, %36, %39 : vector<16x16xi32>
    %41 = arith.andi %38, %40 : vector<16x16xi1>
    %cst_20 = arith.constant dense<true> : vector<16x16xi1>
    %42 = arith.xori %38, %cst_20 : vector<16x16xi1>
    %cst_21 = arith.constant dense<true> : vector<16x16xi1>
    %43 = arith.xori %40, %cst_21 : vector<16x16xi1>
    %44 = arith.andi %42, %43 : vector<16x16xi1>
    %cst_22 = arith.constant 1.562500e-02 : f32
    %cst_23 = arith.constant -1.562500e-02 : f32
    %45 = vector.broadcast %cst_22 : f32 to vector<16x16xf32>
    %46 = vector.broadcast %cst_23 : f32 to vector<16x16xf32>
    %47 = arith.select %44, %45, %46 : vector<16x16xi1>, vector<16x16xf32>
    %cst_24 = arith.constant 1.562500e-02 : f32
    %48 = vector.broadcast %cst_24 : f32 to vector<16x16xf32>
    %49 = arith.select %41, %48, %47 : vector<16x16xi1>, vector<16x16xf32>
    %50 = arith.mulf %49, %34 : vector<16x16xf32>
    %51 = vector.shape_cast %50 : vector<16x16xf32> to vector<1x16x16xf32>
    %cst_25 = arith.constant dense<0.000000e+00> : vector<1xf32>
    %52 = vector.multi_reduction <add>, %51, %cst_25 [1, 2] : vector<1x16x16xf32> to vector<1xf32>
    %53 = vector.shape_cast %52 : vector<1xf32> to vector<1x1x1xf32>
    %54 = vector.extract %53[0, 0, 0] : f32 from vector<1x1x1xf32>
    %cst_26 = arith.constant dense<0.000000e+00> : vector<32xf32>
    %55 = vector.multi_reduction <add>, %17, %cst_26 [0] : vector<8x32xf32> to vector<32xf32>
    %56 = vector.shape_cast %55 : vector<32xf32> to vector<1x32xf32>
    %cst_27 = arith.constant 1.250000e-01 : f32
    %57 = vector.broadcast %cst_27 : f32 to vector<1x32xf32>
    %58 = arith.mulf %56, %57 : vector<1x32xf32>
    %cst_28 = arith.constant dense<0.000000e+00> : vector<32xf32>
    %59 = vector.multi_reduction <add>, %18, %cst_28 [0] : vector<8x32xf32> to vector<32xf32>
    %60 = vector.shape_cast %59 : vector<32xf32> to vector<1x32xf32>
    %cst_29 = arith.constant 1.250000e-01 : f32
    %61 = vector.broadcast %cst_29 : f32 to vector<1x32xf32>
    %62 = arith.mulf %60, %61 : vector<1x32xf32>
    %63 = vector.broadcast %58 : vector<1x32xf32> to vector<8x32xf32>
    %64 = arith.subf %17, %63 : vector<8x32xf32>
    %65 = vector.broadcast %62 : vector<1x32xf32> to vector<8x32xf32>
    %66 = arith.subf %18, %65 : vector<8x32xf32>
    %67 = tpu.concatenate %64, %66 in 1 : vector<8x32xf32>, vector<8x32xf32> -> vector<8x64xf32>
    %cst_30 = arith.constant dense<0.000000e+00> : vector<64x64xf32>
    %68 = tpu.matmul %67, %67, %cst_30 {dimension_numbers = #tpu.dot_dimension_numbers<[0], [0], [1], [1], [0, 1, 1, 1], [], []>} : vector<8x64xf32>, vector<8x64xf32>, vector<64x64xf32> -> vector<64x64xf32>
    %69 = vector.extract_strided_slice %68 {offsets = [0, 0], sizes = [32, 32], strides = [1, 1]} : vector<64x64xf32> to vector<32x32xf32>
    %cst_31 = arith.constant 0.142857149 : f32
    %70 = vector.broadcast %cst_31 : f32 to vector<32x32xf32>
    %71 = arith.mulf %69, %70 : vector<32x32xf32>
    %72 = vector.extract_strided_slice %68 {offsets = [32, 32], sizes = [32, 32], strides = [1, 1]} : vector<64x64xf32> to vector<32x32xf32>
    %cst_32 = arith.constant 0.142857149 : f32
    %73 = vector.broadcast %cst_32 : f32 to vector<32x32xf32>
    %74 = arith.mulf %72, %73 : vector<32x32xf32>
    %c0_33 = arith.constant 0 : index
    %c0_34 = arith.constant 0 : index
    %75 = vector.load %arg6[%c0_33, %c0_34] : memref<32x1xf32, #tpu.memory_space<vmem>>, vector<32x1xf32>
    %cst_35 = arith.constant dense<0.000000e+00> : vector<8x1xf32>
    %76 = tpu.matmul %17, %75, %cst_35 {dimension_numbers = #tpu.dot_dimension_numbers<[1], [0], [0], [1], [0, 0, 1, 1], [], []>} : vector<8x32xf32>, vector<32x1xf32>, vector<8x1xf32> -> vector<8x1xf32>
    %c0_36 = arith.constant 0 : index
    %c0_37 = arith.constant 0 : index
    %77 = vector.load %arg7[%c0_36, %c0_37] : memref<1x1xf32, #tpu.memory_space<vmem>>, vector<1x1xf32>
    %78 = vector.broadcast %77 : vector<1x1xf32> to vector<8x1xf32>
    %79 = arith.addf %76, %78 : vector<8x1xf32>
    %cst_38 = arith.constant 0.000000e+00 : f32
    %80 = vector.broadcast %cst_38 : f32 to vector<24x1xf32>
    %81 = tpu.concatenate %79, %80 in 0 : vector<8x1xf32>, vector<24x1xf32> -> vector<32x1xf32>
    %82 = vector.broadcast %54 : f32 to vector<32x63xf32>
    %83 = tpu.concatenate %71, %74, %81, %82 in 1 : vector<32x32xf32>, vector<32x32xf32>, vector<32x1xf32>, vector<32x63xf32> -> vector<32x128xf32>
    %c0_39 = arith.constant 0 : index
    %c0_40 = arith.constant 0 : index
    %84 = vector.load %arg8[%c0_39, %c0_40] : memref<32x128xf32, #tpu.memory_space<vmem>>, vector<32x128xf32>
    tpu.vector_store %arg8[%c0_39, %c0_40], %83 {strides = array<i32>} : memref<32x128xf32, #tpu.memory_space<vmem>>, vector<32x128xf32>,
    return
  }
}

</mosaic_0001>

<bundles_post_ra>
// kernel: tpu_custom_call.1
= control target key start
LH: loop header
LB: loop body
LE: loop exit
PB: predicated region body
PF: predicated region fallthrough
CT: control target
= control target key end

     0   :  { %s1128_s0 = inlined_call_operand.hbm [shape: f32[8,11], index: 0, kind: input, shape index: {}]   ;;  %s1129_s1 = inlined_call_operand.hbm [shape: f32[8,11], index: 1, kind: input, shape index: {}]   ;;  %s1130_s2 = inlined_call_operand.vmem [shape: f32[11,32], index: 2, kind: input, shape index: {}]   ;;  %s1131_s3 = inlined_call_operand.vmem [shape: f32[1,32], index: 3, kind: input, shape index: {}]   ;;  %s1132_s4 = inlined_call_operand.vmem [shape: f32[32,32], index: 4, kind: input, shape index: {}]   ;;  %s1133_s5 = inlined_call_operand.vmem [shape: f32[1,32], index: 5, kind: input, shape index: {}]   ;;  %s1134_s6 = inlined_call_operand.vmem [shape: f32[32,1], index: 6, kind: input, shape index: {}]   ;;  %s1135_s7 = inlined_call_operand.<no memory space> [shape: f32[1,1], index: 7, kind: input, shape index: {}]   ;;  %s1136_s8 = inlined_call_operand.hbm [shape: f32[32,128], index: 8, kind: output, shape index: {}]  }
   0x1   :  { %v13_v0 = vstv %s1135_s7 }
   0x2   :  { %14 = vst [vmem:[#allocation2] sm:$0x1] %v13_v0 }
   0x3   :  { %15 = vsyncpa [#allocation4], 0 }
   0x4   :  { %16 = vsyncpa [#allocation7], 0 }
   0x5   :  { %17 = vsyncpa [#allocation5], 0  ;;  %s957_s29 = smov [#allocation3]   ;;  %s958_s9 = smov [#allocation6]  }
   0x6   :  { %s24_s30 = sshll.u32 %s957_s29, 4  ;;  %s34_s10 = sshll.u32 %s958_s9, 4  ;;  %s25_s30 = int_to_ptr.vmem [resolvable:$true] %s24_s30  ;;  %s35_s10 = int_to_ptr.vmem [resolvable:$true] %s34_s10 }
   0x7   :  { %s885_s13 = scalar_lea.hbm %s1128_s0, 128 }
   0x8   :  { %p886_p0 = scmp.ne.s32.totalorder %s1128_s0, %s885_s13  ;;  %p889_p1 = scmp.lt.u32.totalorder %s885_s13, %s1128_s0 }
   0xa   :  { %p891_p2 = pnand %p889_p1, %p886_p0 }
   0xc   :  { %894 = shalt.err (!%p891_p2)
}
   0xd   :  { %s895_s17 = scalar_lea.vmem %s25_s30, 128  ;;  %p900_p4 = scmp.lt.s32.totalorder %s25_s30, %s25_s30 }
   0xe   :  { %p896_p3 = scmp.ne.s32.totalorder %s25_s30, %s895_s17  ;;  %p901_p5 = scmp.lt.s32.totalorder %s895_s17, %s895_s17 }
  0x10   :  { %p902_p6 = por %p901_p5, %p900_p4 }
  0x12   :  { %p903_p7 = pnand %p902_p6, %p896_p3 }
  0x14   :  { %906 = shalt.err (!%p903_p7)
}
  0x15   :  { %27 = dma.hbm_to_vmem [thread:$0]  %s1128_s0, 128, %s25_s30, [#allocation4]  }
  0x16   :  { %s907_s22 = scalar_lea.hbm %s1129_s1, 128 }
  0x17   :  { %p908_p8 = scmp.ne.s32.totalorder %s1129_s1, %s907_s22  ;;  %p911_p9 = scmp.lt.u32.totalorder %s907_s22, %s1129_s1 }
  0x19   :  { %p913_p10 = pnand %p911_p9, %p908_p8 }
  0x1b   :  { %916 = shalt.err (!%p913_p10)
}
  0x1c   :  { %s917_s27 = scalar_lea.vmem %s35_s10, 128  ;;  %p922_p12 = scmp.lt.s32.totalorder %s35_s10, %s35_s10 }
  0x1d   :  { %p918_p11 = scmp.ne.s32.totalorder %s35_s10, %s917_s27  ;;  %p923_p13 = scmp.lt.s32.totalorder %s917_s27, %s917_s27 }
  0x1f   :  { %p924_p0 = por %p923_p13, %p922_p12 }
  0x21   :  { %p925_p1 = pnand %p924_p0, %p918_p11 }
  0x23   :  { %928 = shalt.err (!%p925_p1)
}
  0x24   :  { %37 = dma.hbm_to_vmem [thread:$0]  %s1129_s1, 128, %s35_s10, [#allocation7]  }
  0x25   :  { %951 = dma.done.wait [#allocation4], 128  }
  0x26   :  { %952 = vsyncadd [#allocation4], 4294967168 }
  0x27   :  { %953 = dma.done.wait [#allocation7], 128  }
  0x28   :  { %954 = vsyncadd [#allocation7], 4294967168  ;;  %vm74_vm0 = vcmask 1042432   ;;  %vm67_vm1 = vcmask 89088   ;;  %vm959_vm2 = vmmov 1   ;;  %v58_v1 = vld [vmem:[%s1130_s2] sm:$0xff] }
  0x29   :  { %vm842_vm3 = vmpackc.low %vm74_vm0, %vm959_vm2  ;;  %v59_v2 = vld [vmem:[%s1130_s2 + $0x8] sm:$0x7]  ;;  %v155_v5 = vld [vmem:[%s1132_s4] sm:$0xff]  ;;  %vm166_vm4 = vcmask 261120   ;;  %v960_v32 = vmov 0.0|0.0   ;;  %vm961_vm6 = vmmov 0  }
  0x2a   :  { %v56_v3 = vld [vmem:[#allocation3] sm:$0xff]  ;;  %v841_v4 = vpack.c.bf16 %v59_v2, %v58_v1  ;;  %v57_v8 = vld [vmem:[#allocation6] sm:$0xff]  ;;  %v158_v10 = vld [vmem:[%s1132_s4 + $0x18] sm:$0xff]  ;;  %v962_v43 = vmov 0.0   ;;  %s963_s25 = smov 32   ;;  %vm478_vm7 = vcmask 64512  }
  0x2b   :  { %795 = vmatprep.mubr.msk.f32.mxu0 %vm67_vm1, %v56_v3  ;;  %v156_v6 = vld [vmem:[%s1132_s4 + $0x8] sm:$0xff]  ;;  %v157_v9 = vld [vmem:[%s1132_s4 + $0x10] sm:$0xff]  ;;  %v742_v12 = vld [vmem:[%s1131_s3] ss:$0 sm:$0xff]  ;;  %vm410_vm10 = vcmask 130048   ;;  %s966_s26 = smov [#allocation8]  }
  0x2c   :  { %v847_v7 = vpack.c.bf16 %v156_v6, %v155_v5  ;;  %843 = vmatprep.subr.msk.bf16.mxu0 %vm842_vm3, %v841_v4  ;;  %v851_v11 = vpack.c.bf16 %v158_v10, %v157_v9  ;;  %v746_v19 = vld [vmem:[%s1133_s5] ss:$0 sm:$0xff]  ;;  %vm856_vm5 = vmpackc.low %vm166_vm4, %vm166_vm4  ;;  %v617_v34 = vld [vmem:[%s1134_s6 + $0x8] sm:$0xff]  ;;  %s729_s27 = sshll.u32 %s966_s26, 4  ;;  %vm710_vm11 = vcmask 523264   ;;  %vm715_vm12 = vcmask 531456   ;;  %s1109_s27 = int_to_ptr.vmem [resolvable:$true] %s729_s27 }
  0x2d   :  { %846 = vmatpush3.bf16.msk.msra.mxu0 %vm842_vm3, %v841_v4  ;;  %v616_v33 = vld [vmem:[%s1134_s6] sm:$0xff]  ;;  %v618_v38 = vld [vmem:[%s1134_s6 + $0x10] sm:$0xff]  ;;  %v619_v39 = vld [vmem:[%s1134_s6 + $0x18] sm:$0xff]  ;;  %s964_s6 = smov 64   ;;  %s929_s28 = scalar_lea.vmem %s1109_s27, 512 }
  0x2e   :  { %848 = vmatprep.subr.bf16.mxu1 %v847_v7  ;;  %v862_v37 = vpack.c.bf16 %v617_v34, %v616_v33  ;;  %v865_v42 = vpack.c.bf16 %v619_v39, %v618_v38  ;;  %v761_v63 = vld [vmem:[#allocation2] ss:$0 sm:$0xff]  ;;  %p930_p2 = scmp.ne.s32.totalorder %s1109_s27, %s929_s28  ;;  %p934_p3 = scmp.lt.s32.totalorder %s1109_s27, %s1109_s27 }
  0x2f   :  { %850 = vmatpush3.bf16.msra.mxu1 %v847_v7  ;;  %p935_p4 = scmp.lt.s32.totalorder %s929_s28, %s929_s28 }
  0x30   :  { %796 = vmatmul.mubr.msk.f32.vlgmr.msra.gmra.mrb[0].mxu0 %vm67_vm1, %v57_v8  ;;  %852 = vmatprep.subr.bf16.mxu1 %v851_v11 }
  0x31   :  { %p936_p5 = por %p935_p4, %p934_p3 }
  0x33   :  { %854 = vmatpush3.bf16.msra.mxu1 %v851_v11  ;;  %v371_v11 = vlaneseq  ;;  %p937_p6 = pnand %p936_p5, %p930_p2 }
 0x103   :  { %v797_v13 = vpop.f32.mrb[0].mxu0 }
 0x104   :  { %v150_v14 = vadd.f32 %v797_v13, %v742_v12  ;;  %v144_v15 = vpop.f32.mrb[1].mxu0 }
 0x105   :  { %v145_v16 = vadd.f32 %v742_v12, %v144_v15  ;;  %v372_v12 = vshrl.u32 %v371_v11, 7 }
 0x106   :  { %v154_v18 = vmax.f32 %v150_v14, 0.0 }
 0x107   :  { %v153_v17 = vmax.f32 %v145_v16, 0.0  ;;  %v373_v13 = vsub.s32 0, %v372_v12 }
 0x109   :  { %806 = vmatprep.mubr.msk.f32.mxu1 %vm166_vm4, %v153_v17 }
 0x10a   :  { %807 = vmatmul.mubr.msk.f32.vlgmr.msra.gmra.mrb[0].mxu1 %vm166_vm4, %v154_v18 }
 0x1dd   :  { %v808_v20 = vpop.f32.mrb[0].mxu1 }
 0x1de   :  { %v245_v21 = vadd.f32 %v808_v20, %v746_v19  ;;  %v239_v22 = vpop.f32.mrb[1].mxu1 }
 0x1df   :  { %v240_v23 = vadd.f32 %v746_v19, %v239_v22 }
 0x1e0   :  { %v249_v24 = vmax.f32 %v245_v21, 0.0 }
 0x1e1   :  { %v248_v25 = vmax.f32 %v240_v23, 0.0 }
 0x1e2   :  { %v332_v26 = vmul.f32 %v249_v24, %v249_v24  ;;  %v431_v27 = vsel %vm166_vm4, %v249_v24, 0.0 }
 0x1e3   :  { %813 = vmatprep.mubr.msk.f32.mxu0 %vm166_vm4, %v248_v25  ;;  %v855_v28 = vpack.c.bf16 %v249_v24, %v248_v25  ;;  %v432_v29 = vrot.slane %v431_v27, 4  ;;  %v331_v46 = vmul.f32 %v248_v25, %v248_v25  ;;  %v423_v48 = vsel %vm166_vm4, %v248_v25, 0.0 }
 0x1e4   :  { %v336_v30 = vsel %vm166_vm4, %v332_v26, 0.0  ;;  %v424_v49 = vrot.slane %v423_v48, 4 }
 0x1e5   :  { %337 = vadd.xlane.f32.xlu1 %v336_v30  ;;  %857 = vmatprep.subr.msk.bf16.mxu0 %vm856_vm5, %v855_v28  ;;  %v433_v31 = vadd.f32 %v432_v29, %v431_v27  ;;  %v333_v47 = vsel %vm166_vm4, %v331_v46, 0.0  ;;  %v965_v29 = vmov -0.015625  }
 0x1e6   :  { %860 = vmatpush3.bf16.xpose.msk.msra.mxu0 %vm856_vm5, %v855_v28  ;;  %v425_v50 = vadd.f32 %v424_v49, %v423_v48  ;;  %v393_v28 = vand.u32 127, %v371_v11 }
 0x1e7   :  { %861 = vmatprep.subr.bf16.mxu0 %v960_v32  ;;  %v434_v35 = vrot.slane %v433_v31, 2 }
 0x1e8   :  { %v426_v51 = vrot.slane %v425_v50, 2  ;;  %vm396_vm8 = vcmp.lt.s32.totalorder %v393_v28, 8 }
 0x1e9   :  { %v435_v36 = vadd.f32 %v434_v35, %v433_v31  ;;  %vm401_vm9 = vmxor %vm396_vm8, %vm959_vm2  ;;  %v406_v30 = vsel %vm396_vm8, 0.015625, %v965_v29 }
 0x1ea   :  { %v427_v52 = vadd.f32 %v426_v51, %v425_v50  ;;  %v405_v31 = vsel %vm401_vm9, 0.015625, %v965_v29 }
 0x1eb   :  { %v436_v40 = vrot.slane %v435_v36, 1 }
 0x1ec   :  { %v428_v53 = vrot.slane %v427_v52, 1 }
 0x1ed   :  { %814 = vmatmul.mubr.msk.f32.vlgmr.msra.gmra.mrb[2].mxu0 %vm166_vm4, %v249_v24  ;;  %v437_v41 = vadd.f32 %v436_v40, %v435_v36 }
 0x1ee   :  { %863 = vmatpush3.bf16.msra.mxu0 %v862_v37  ;;  %838 = vmatprep.mubr.msk.f32.mxu0 %vm961_vm6, %v962_v43  ;;  %v429_v54 = vadd.f32 %v428_v53, %v427_v52 }
 0x1ef   :  { %864 = vmatprep.subr.bf16.mxu0 %v960_v32  ;;  %v438_v44 = vmul.f32 0.125, %v437_v41 }
 0x1f0   :  { %v430_v55 = vmul.f32 0.125, %v429_v54 }
 0x1f1   :  { %v440_v45 = vsub.f32 %v249_v24, %v438_v44 }
 0x1f2   :  { %866 = vmatpush3.bf16.msra.mxu0 %v865_v42  ;;  %v439_v56 = vsub.f32 %v248_v25, %v430_v55 }
 0x1f3   :  { %442 = vrot.lane.b32.xlu0 %v440_v45, %s963_s25 }
 0x1f5   :  { %839 = vmatmul.mubr.msk.f32.vlgmr.msra.gmra.mrb[4].mxu0 %vm166_vm4, %v248_v25 }
 0x212   :  { %334 = vadd.xlane.f32.xlu0 %v333_v47 }
 0x265   :  { %v443_v57 = vpop.permute.xlu0 %442 }
 0x266   :  { %v445_v58 = vsel %vm166_vm4, %v439_v56, %v443_v57 }
 0x267   :  { %446 = vxpose.xlu1.b32.start.end [1/1] (short) (narrow) %v445_v58, 64  ;;  %816 = vmatprep.subr.mxu1 %v445_v58 }
 0x268   :  { %817 = vmatpush3.msra.mxu1 %v445_v58 }
 0x272   :  { %v338_v60 = vpop.xlane.xlu1 %337 }
 0x29f   :  { %v335_v59 = vpop.xlane.xlu0 %334 }
 0x2a0   :  { %339 = vxpose.xlu0.b32.start [1/2] (short) (narrow) %v335_v59, 8 }
 0x2a4   :  { %340 = vxpose.xlu0.b32.end [2/2] (short) (narrow) %v338_v60, 8 }
 0x2c0   :  { %v815_v61 = vpop.f32.mrb[2].mxu0 }
 0x2c1   :  { %v322_v62 = vpop.f32.mrb[3].mxu0  ;;  %v378_v16 = vmul.f32 2.0, %v815_v61 }
 0x2c2   :  { %v377_v17 = vmul.f32 2.0, %v322_v62 }
 0x2c8   :  { %v693_v0 = vpop.f32.mrb[4].mxu0 }
 0x2c9   :  { %v840_v1 = vpop.f32.mrb[5].mxu0  ;;  %v694_v2 = vadd.f32 %v761_v63, %v693_v0 }
 0x2cd   :  { %700 = vrot.lane.b32.xlu0 %v694_v2, %s964_s6 }
 0x2e7   :  { %v462_v3 = vpop.trf.xlu1 }
 0x2e8   :  { %818 = vmatprep.mubr.msk.f32.mxu1 %vm478_vm7, %v462_v3 }
 0x2eb   :  { %v463_v4 = vpop.trf.xlu1 }
 0x2ec   :  { %819 = vmatmul.mubr.msk.f32.vlgmr.msra.gmra.mrb[2].mxu1 %vm478_vm7, %v463_v4 }
 0x2ef   :  { %v464_v5 = vpop.trf.xlu1 }
 0x2f0   :  { %821 = vmatprep.mubr.msk.f32.mxu1 %vm478_vm7, %v464_v5 }
 0x2f3   :  { %v465_v6 = vpop.trf.xlu1 }
 0x2f4   :  { %822 = vmatmul.mubr.msk.f32.gmra.mrb[4].mxu1 %vm478_vm7, %v465_v6 }
 0x2f7   :  { %v466_v7 = vpop.trf.xlu1 }
 0x2f8   :  { %824 = vmatprep.mubr.msk.f32.mxu1 %vm478_vm7, %v466_v7 }
 0x2fb   :  { %v467_v8 = vpop.trf.xlu1 }
 0x2fc   :  { %825 = vmatmul.mubr.msk.f32.gmra.mrb[6].mxu1 %vm478_vm7, %v467_v8 }
 0x2ff   :  { %v468_v9 = vpop.trf.xlu1 }
 0x300   :  { %827 = vmatprep.mubr.msk.f32.mxu1 %vm478_vm7, %v468_v9 }
 0x303   :  { %v469_v10 = vpop.trf.xlu1 }
 0x304   :  { %828 = vmatmul.mubr.msk.f32.gmra.mrb[8].mxu1 %vm478_vm7, %v469_v10 }
 0x320   :  { %v355_v14 = vpop.trf.xlu0 }
 0x321   :  { %v374_v15 = vrot.slane %v355_v14, %v373_v13 }
 0x323   :  { %v375_v18 = vadd.f32 %v374_v15, %v335_v59  ;;  %v376_v19 = vadd.f32 %v374_v15, %v338_v60 }
 0x325   :  { %v379_v20 = vsub.f32 %v375_v18, %v377_v17  ;;  %v380_v21 = vsub.f32 %v376_v19, %v378_v16 }
 0x327   :  { %v381_v22 = vmax.f32 %v379_v20, 0.0  ;;  %v382_v23 = vmax.f32 %v380_v21, 0.0 }
 0x329   :  { %v383_v24 = vmul.f32 -0.015625, %v381_v22  ;;  %v384_v25 = vmul.f32 -0.015625, %v382_v23 }
 0x32b   :  { %v385_v26 = vmul.f32 1.442695, %v383_v24  ;;  %v387_v27 = vmul.f32 1.442695, %v384_v25 }
 0x32d   :  { %881 = vpow2.f32 %v385_v26 }
 0x32e   :  { %883 = vpow2.f32 %v387_v27 }
 0x337   :  { %v882_v32 = vpop.eup %881 }
 0x338   :  { %v884_v33 = vpop.eup %883  ;;  %v408_v34 = vmul.f32 %v882_v32, %v406_v30 }
 0x339   :  { %v409_v35 = vmul.f32 %v884_v33, %v405_v31 }
 0x33a   :  { %v411_v36 = vsel %vm410_vm10, %v408_v34, 0.0 }
 0x33b   :  { %v412_v37 = vsel %vm410_vm10, %v409_v35, 0.0 }
 0x33c   :  { %v413_v38 = vadd.f32 %v412_v37, %v411_v36 }
 0x33e   :  { %414 = vadd.xlane.f32.xlu1 %v413_v38 }
 0x33f   :  { %v701_v3 = vpop.permute.xlu0 %700 }
 0x34f   :  { %702 = vrot.lane.b32.xlu1 %v962_v43, %s964_s6 }
 0x3bf   :  { %v820_v39 = vpop.f32.mrb[2].mxu1 }
 0x3c0   :  { %v569_v40 = vpop.f32.mrb[3].mxu1  ;;  %v609_v47 = vmul.f32 0.14285715, %v820_v39 }
 0x3c1   :  { %v608_v48 = vmul.f32 0.14285715, %v569_v40 }
 0x3c7   :  { %v823_v41 = vpop.f32.mrb[4].mxu1 }
 0x3c8   :  { %v579_v42 = vpop.f32.mrb[5].mxu1  ;;  %v611_v57 = vmul.f32 0.14285715, %v823_v41 }
 0x3c9   :  { %v610_v59 = vmul.f32 0.14285715, %v579_v42 }
 0x3cb   :  { %v415_v44 = vpop.xlane.xlu1 %414 }
 0x3cc   :  { %v416_v45 = vrot.slane %v415_v44, 4 }
 0x3ce   :  { %v417_v46 = vadd.f32 %v416_v45, %v415_v44 }
 0x3cf   :  { %v826_v49 = vpop.f32.mrb[6].mxu1  ;;  %v703_v2 = vpop.permute.xlu1 %702 }
 0x3d0   :  { %v418_v50 = vrot.slane %v417_v46, 2  ;;  %v613_v51 = vmul.f32 0.14285715, %v826_v49  ;;  %v589_v52 = vpop.f32.mrb[7].mxu1 }
 0x3d1   :  { %v612_v53 = vmul.f32 0.14285715, %v589_v52 }
 0x3d2   :  { %v419_v54 = vadd.f32 %v418_v50, %v417_v46  ;;  %v707_v55 = vsel %vm166_vm4, %v609_v47, %v613_v51 }
 0x3d3   :  { %v706_v56 = vsel %vm166_vm4, %v608_v48, %v612_v53  ;;  %v712_v4 = vsel %vm710_vm11, %v707_v55, %v703_v2 }
 0x3d4   :  { %v420_v43 = vrot.slane %v419_v54, 1  ;;  %v711_v6 = vsel %vm710_vm11, %v706_v56, %v701_v3 }
 0x3d6   :  { %v421_v58 = vadd.f32 %v420_v43, %v419_v54 }
 0x3d7   :  { %v829_v60 = vpop.f32.mrb[8].mxu1 }
 0x3d8   :  { %867 = vpush %v421_v58  ;;  %v615_v61 = vmul.f32 0.14285715, %v829_v60  ;;  %v599_v62 = vpop.f32.mrb[9].mxu1 }
 0x3d9   :  { %v614_v63 = vmul.f32 0.14285715, %v599_v62 }
 0x3da   :  { %v709_v0 = vsel %vm166_vm4, %v611_v57, %v615_v61 }
 0x3db   :  { %v708_v1 = vsel %vm166_vm4, %v610_v59, %v614_v63  ;;  %v714_v8 = vsel %vm710_vm11, %v709_v0, %v703_v2 }
 0x3dc   :  { %v713_v7 = vsel %vm710_vm11, %v708_v1, %v703_v2 }
 0x409   :  { %s868_s0 = spop %867 }
 0x40a   :  { %v697_v5 = vstv %s868_s0 }
 0x40b   :  { %v716_v9 = vsel %vm715_vm12, %v711_v6, %v697_v5  ;;  %v717_v10 = vsel %vm715_vm12, %v712_v4, %v697_v5  ;;  %v718_v11 = vsel %vm715_vm12, %v713_v7, %v697_v5  ;;  %v719_v12 = vsel %vm715_vm12, %v714_v8, %v697_v5 }
 0x40c   :  { %720 = vst [vmem:[#allocation8] sm:$0xff] %v716_v9  ;;  %721 = vst [vmem:[#allocation8 + $0x8] sm:$0xff] %v717_v10 }
 0x40d   :  { %722 = vst [vmem:[#allocation8 + $0x10] sm:$0xff] %v718_v11  ;;  %723 = vst [vmem:[#allocation8 + $0x18] sm:$0xff] %v719_v12 }
 0x40e   :  { %940 = shalt.err (!%p937_p6)
}
 0x40f   :  { %s941_s9 = scalar_lea.hbm %s1136_s8, 512 }
 0x410   :  { %p942_p7 = scmp.ne.s32.totalorder %s1136_s8, %s941_s9  ;;  %p945_p8 = scmp.lt.u32.totalorder %s941_s9, %s1136_s8 }
 0x412   :  { %p947_p9 = pnand %p945_p8, %p942_p7 }
 0x414   :  { %950 = shalt.err (!%p947_p9)
}
 0x415   :  { %s967_s13 = smov 128   ;;  %s968_s2 = smov 8  }
 0x416   :  { %735 = dma.vmem_to_hbm [thread:$0]  %s1109_s27, 512, %s1136_s8, [#allocation5], %s967_s13, %s967_s13, %s968_s2  }
 0x417   :  { %955 = dma.done.wait [#allocation5], 512  }
 0x418   :  { %956 = vsyncadd [#allocation5], 4294966784 }
 0x419   :  { %739 = vsyncpa [#allocation4], 1 }
 0x41a   :  { %740 = vsyncpa [#allocation7], 1 }
 0x41b   :  { %741 = vsyncpa [#allocation5], 1 }

</bundles_post_ra>
